<compile_context>
chip_gen: v6e
topology: v6e:2x2x1
jax: 0.10.0
libtpu: 0.0.40
codegen_flags: <defaults>
</compile_context>

<pallas_src>
import functools

import jax
import jax.numpy as jnp
from jax.experimental import pallas as pl
from jax.experimental.pallas import tpu as pltpu

EPS = 1e-12                      # matches torch.nn.functional.normalize eps
TILE_B = 128                     # fixed batch tile: single compile, pipelined grid
VMEM_LIMIT = 32 * 1024 * 1024    # safe on v5e/v6e (128 MiB) and v7x (64 MiB/TC)


def _round_up(x, m):
    return ((x + m - 1) // m) * m


# ----------------------------------------------------------------------------
# Kernel
# ----------------------------------------------------------------------------
def coda_prompt_kernel(x_ref, ahat_ref, asq_ref, p_ref, out_ref):
    """Fused CodaPrompt hot path for one batch tile.

    Reference semantics (PyTorch):
        a_querry = einsum('bd,kd->bkd', x, A)
        n_K      = F.normalize(K, dim=1)
        q        = F.normalize(a_querry, dim=2)
        aq_k     = einsum('bkd,kd->bk', q, n_K)
        P_       = einsum('bk,kld->bld', aq_k, p)

    With A_hat = (A * n_K)^T (bf16) and A_sq = (A * A)^T (f32) precomputed:
        num  = x @ A_hat                      # (TB, P)   bf16 x bf16 MXU
        den  = (x*x) @ A_sq                   # (TB, P)   = ||x[b]*A[k]||^2, f32
        aq_k = num * rsqrt(max(den, EPS^2))   # == num / max(sqrt(den), EPS)
        out  = aq_k @ p_flat                  # (TB, L*De), stored bf16
    """
    x = x_ref[...]                                                    # (TB, Dk) f32

    num = jnp.dot(x.astype(jnp.bfloat16), ahat_ref[...],
                  preferred_element_type=jnp.float32)                 # (TB, P)
    den = jnp.dot(x * x, asq_ref[...],
                  preferred_element_type=jnp.float32)                 # (TB, P)

    # single EUP rsqrt instead of sqrt + divide
    aq_k = num * jax.lax.rsqrt(jnp.maximum(den, EPS * EPS))           # (TB, P)

    # bf16 x bf16 MXU matmul, f32 accumulation, bf16 writeback
    out = jnp.dot(aq_k.astype(p_ref.dtype), p_ref[...],
                  preferred_element_type=jnp.float32)                 # (TB, L*De)
    out_ref[...] = out.astype(out_ref.dtype)


@functools.partial(jax.jit, static_argnames=("tile_b",))
def _coda_prompt_pallas(x_pad, ahat_t, asq_t, p_flat, *, tile_b):
    b_pad, dk = x_pad.shape
    p_pad, ld = p_flat.shape
    grid = (b_pad // tile_b,)

    flops = 2 * b_pad * dk * p_pad * 2 + 2 * b_pad * p_pad * ld
    bytes_accessed = (x_pad.size * 4 + ahat_t.size * 2 + asq_t.size * 4
                      + p_flat.size * 2 + b_pad * ld * 2)
    cost = pl.CostEstimate(flops=flops,
                           transcendentals=b_pad * p_pad,
                           bytes_accessed=bytes_accessed)

    return pl.pallas_call(
        coda_prompt_kernel,
        out_shape=jax.ShapeDtypeStruct((b_pad, ld), jnp.bfloat16),
        grid=grid,
        in_specs=[
            pl.BlockSpec((tile_b, dk), lambda i: (i, 0)),   # streamed x tile
            pl.BlockSpec((dk, p_pad), lambda i: (0, 0)),    # resident (A*n_K)^T bf16
            pl.BlockSpec((dk, p_pad), lambda i: (0, 0)),    # resident (A*A)^T   f32
            pl.BlockSpec((p_pad, ld), lambda i: (0, 0)),    # resident p_flat    bf16
        ],
        out_specs=pl.BlockSpec((tile_b, ld), lambda i: (i, 0)),
        compiler_params=pltpu.CompilerParams(
            dimension_semantics=("parallel",),
            vmem_limit_bytes=VMEM_LIMIT),
        cost_estimate=cost,
    )(x_pad, ahat_t, asq_t, p_flat)


# ----------------------------------------------------------------------------
# Module wrapper
# ----------------------------------------------------------------------------
class CodaPromptPallas:
    """JAX/Pallas re-implementation of models/zoo.py::CodaPrompt (eval forward)."""

    def __init__(self, emb_d, n_tasks, prompt_param, key_dim=768, seed=0):
        self.task_count = 0
        self.emb_d = emb_d
        self.key_d = key_dim
        self.n_tasks = n_tasks
        self.e_pool_size = int(prompt_param[0])
        self.e_p_length = int(prompt_param[1])
        self.ortho_mu = prompt_param[2]
        self.e_layers = [0, 1, 2, 3, 4]

        # pool padded to a full 128-lane MXU pass (unmasked lane/sublane layouts)
        self._pool_pad = _round_up(self.e_pool_size, 128)

        pt = self.e_pool_size // self.n_tasks
        key = jax.random.PRNGKey(seed)
        self.params = {}         # raw (p, K, A) in f32, for reference checks
        self.kernel_params = {}  # (A_hat^T bf16, A_sq^T f32, p_flat bf16), padded
        for e in self.e_layers:
            key, kp, kk, ka = jax.random.split(key, 4)
            p = self._ortho_init(kp, self.e_pool_size,
                                 self.e_p_length * self.emb_d, pt)
            p = p.reshape(self.e_pool_size, self.e_p_length, self.emb_d)
            k = self._ortho_init(kk, self.e_pool_size, self.key_d, pt)
            a = self._ortho_init(ka, self.e_pool_size, self.key_d, pt)
            self.params[e] = (p, k, a)
            self.kernel_params[e] = self._precompute(p, k, a)

    @staticmethod
    def _ortho_init(key, pool, dim, pt):
        # Deterministic equivalent of gram_schmidt at task_count == 0: first
        # `pt` rows orthonormal (random Gaussians via QR), remaining rows zero
        # (the torch gram_schmidt only fills rows [0, f)).
        # TODO(synk): the torch version uses a sequential randn-restart
        # Gram-Schmidt loop; QR gives the same orthonormality property but not
        # the same bits — load real checkpoints externally for exact parity.
        g = jax.random.normal(key, (dim, pt), dtype=jnp.float32)
        q, _ = jnp.linalg.qr(g)                          # (dim, pt)
        return jnp.zeros((pool, dim), jnp.float32).at[:pt].set(q.T)

    def _precompute(self, p, K, A):
        """Hoist all weight-side math out of the kernel (once per layer/task).

        The eval path of the reference uses K[:f] / A[:f] / p[:f]; rows >= f
        are masked to zero explicitly so the fixed-shape padded pool stays
        correct even for checkpoints whose future-task rows are non-zero.
        """
        P = self.e_pool_size
        pt = P // self.n_tasks
        f = (self.task_count + 1) * pt
        pad = self._pool_pad

        mask = (jnp.arange(pad) < f).astype(jnp.float32)[:, None]
        Kp = jnp.zeros((pad, self.key_d), jnp.float32).at[:P].set(K) * mask
        Ap = jnp.zeros((pad, self.key_d), jnp.float32).at[:P].set(A) * mask
        pp = (jnp.zeros((pad, self.e_p_length * self.emb_d), jnp.float32)
              .at[:P].set(p.reshape(P, -1)) * mask)

        n_K = Kp / jnp.maximum(jnp.linalg.norm(Kp, axis=1, keepdims=True), EPS)
        a_hat_t = (Ap * n_K).T.astype(jnp.bfloat16)      # (Dk, P_pad)   bf16
        a_sq_t = (Ap * Ap).T.astype(jnp.float32)         # (Dk, P_pad)   f32
        p_flat = pp.astype(jnp.bfloat16)                 # (P_pad, L*De) bf16
        return a_hat_t, a_sq_t, p_flat

    def process_task_count(self):
        # TODO(synk): the reference re-runs its sequential gram_schmidt to
        # re-initialize rows [s, f) for the new task; here we only extend the
        # valid-row mask (load trained rows externally for exact parity).
        self.task_count += 1
        for e in self.e_layers:
            p, k, a = self.params[e]
            self.kernel_params[e] = self._precompute(p, k, a)

    def forward(self, x_querry, l, x_block, train=False):
        if l not in self.e_layers:
            return None, 0.0, x_block

        B = x_querry.shape[0]
        a_hat_t, a_sq_t, p_flat = self.kernel_params[l]

        # fixed tile: pad the batch up to a TILE_B multiple (unmasked stores,
        # one compile per distinct padded batch size)
        b_pad = _round_up(max(B, 1), TILE_B)
        x = x_querry.astype(jnp.float32)
        if b_pad != B:
            x = jnp.pad(x, ((0, b_pad - B), (0, 0)))

        out_flat = _coda_prompt_pallas(x, a_hat_t, a_sq_t, p_flat,
                                       tile_b=TILE_B)

        L, De = self.e_p_length, self.emb_d
        # Returned prompts stay in bf16 (downstream attention consumes bf16
        # prompts); values match the f32 reference within bf16 precision.
        P_ = out_flat[:B].reshape(B, L, De)
        i = L // 2
        Ek = P_[:, :i, :]
        Ev = P_[:, i:, :]

        # TODO(synk): ortho_penalty loss only exercised when train=True; the
        # eval forward returns loss = 0 exactly as the reference module does.
        loss = 0.0
        return [Ek, Ev], loss, x_block


# ----------------------------------------------------------------------------
# Pure-JAX reference (mirrors the PyTorch einsum/normalize sequence)
# ----------------------------------------------------------------------------
def _forward_ref(x, K, A, p):
    a_querry = jnp.einsum('bd,kd->bkd', x, A)
    n_K = K / jnp.maximum(jnp.linalg.norm(K, axis=1, keepdims=True), EPS)
    q = a_querry / jnp.maximum(
        jnp.linalg.norm(a_querry, axis=2, keepdims=True), EPS)
    aq_k = jnp.einsum('bkd,kd->bk', q, n_K)
    return jnp.einsum('bk,kld->bld', aq_k, p)


if __name__ == "__main__":
    # Small shapes consistent with the module's forward:
    #   emb_d = 32, key_dim = 32, pool = 8, prompt length = 8, n_tasks = 2
    emb_d = 32
    key_dim = 32
    n_tasks = 2
    prompt_param = [8, 8, 0.0]   # [e_pool_size, e_p_length, ortho_mu]
    B = 2
    seq = 8

    module = CodaPromptPallas(emb_d, n_tasks, prompt_param,
                              key_dim=key_dim, seed=0)

    rng = jax.random.PRNGKey(0)
    r_x, r_b = jax.random.split(rng)
    x_querry = jax.random.normal(r_x, (B, key_dim), dtype=jnp.float32)
    x_block = jax.random.normal(r_b, (B, seq, emb_d), dtype=jnp.float32)

    (Ek, Ev), loss, xb = module.forward(x_querry, l=0, x_block=x_block,
                                        train=False)
    jax.block_until_ready((Ek, Ev))

    # Cross-check against a pure-JAX f32 reference.  The kernel runs the
    # num-path and prompt matmuls in bf16 (f32 accumulation) and stores the
    # output in bf16, hence the bf16-appropriate tolerance.
    p, K, A = module.params[0]
    f = (module.task_count + 1) * (module.e_pool_size // module.n_tasks)
    P_ref = _forward_ref(x_querry, K[:f], A[:f], p[:f])
    i = module.e_p_length // 2
    assert Ek.shape == (B, i, emb_d) and Ev.shape == (B, i, emb_d)
    assert Ek.dtype == jnp.bfloat16 and Ev.dtype == jnp.bfloat16
    assert jnp.allclose(Ek.astype(jnp.float32), P_ref[:, :i, :],
                        rtol=3e-2, atol=2e-2)
    assert jnp.allclose(Ev.astype(jnp.float32), P_ref[:, i:, :],
                        rtol=3e-2, atol=2e-2)
    assert float(loss) == 0.0
    assert (xb == x_block).all()

    print("KERNEL_OK")
</pallas_src>

<mosaic_0001>
module attributes {stable_mosaic.version = 11 : i64} {
  func.func @coda_prompt_kernel(%arg0: i32, %arg1: memref<128x32xf32, #tpu.memory_space<vmem>>, %arg2: memref<32x128xbf16, #tpu.memory_space<vmem>>, %arg3: memref<32x128xf32, #tpu.memory_space<vmem>>, %arg4: memref<128x256xbf16, #tpu.memory_space<vmem>>, %arg5: memref<128x256xbf16, #tpu.memory_space<vmem>>) attributes {dimension_semantics = [#tpu.dimension_semantics<parallel>], iteration_bounds = array<i64: 1>, scalar_prefetch = 0 : i64, scratch_operands = 0 : i64, tpu.core_type = #tpu.core_type<tc>, window_params = [{transform_indices = @transform_0, window_bounds = array<i64: 128, 32>}, {pipeline_mode = #tpu.pipeline_mode<synchronous>, transform_indices = @transform_1, window_bounds = array<i64: 32, 128>}, {pipeline_mode = #tpu.pipeline_mode<synchronous>, transform_indices = @transform_2, window_bounds = array<i64: 32, 128>}, {pipeline_mode = #tpu.pipeline_mode<synchronous>, transform_indices = @transform_3, window_bounds = array<i64: 128, 256>}, {transform_indices = @transform_4, window_bounds = array<i64: 128, 256>}]} {
    %c0 = arith.constant 0 : index
    %c0_0 = arith.constant 0 : index
    %0 = vector.load %arg1[%c0, %c0_0] : memref<128x32xf32, #tpu.memory_space<vmem>>, vector<128x32xf32>
    %1 = arith.truncf %0 : vector<128x32xf32> to vector<128x32xbf16>
    %c0_1 = arith.constant 0 : index
    %c0_2 = arith.constant 0 : index
    %2 = vector.load %arg2[%c0_1, %c0_2] : memref<32x128xbf16, #tpu.memory_space<vmem>>, vector<32x128xbf16>
    %cst = arith.constant dense<0.000000e+00> : vector<128x128xf32>
    %3 = tpu.matmul %1, %2, %cst {dimension_numbers = #tpu.dot_dimension_numbers<[1], [0], [0], [1], [0, 0, 1, 1], [], []>} : vector<128x32xbf16>, vector<32x128xbf16>, vector<128x128xf32> -> vector<128x128xf32>
    %4 = arith.mulf %0, %0 : vector<128x32xf32>
    %c0_3 = arith.constant 0 : index
    %c0_4 = arith.constant 0 : index
    %5 = vector.load %arg3[%c0_3, %c0_4] : memref<32x128xf32, #tpu.memory_space<vmem>>, vector<32x128xf32>
    %cst_5 = arith.constant dense<0.000000e+00> : vector<128x128xf32>
    %6 = tpu.matmul %4, %5, %cst_5 {dimension_numbers = #tpu.dot_dimension_numbers<[1], [0], [0], [1], [0, 0, 1, 1], [], []>} : vector<128x32xf32>, vector<32x128xf32>, vector<128x128xf32> -> vector<128x128xf32>
    %cst_6 = arith.constant 1.000000e-24 : f32
    %7 = vector.broadcast %cst_6 : f32 to vector<128x128xf32>
    %8 = arith.maximumf %6, %7 : vector<128x128xf32>
    %9 = math.rsqrt %8 : vector<128x128xf32>
    %10 = arith.mulf %3, %9 : vector<128x128xf32>
    %11 = arith.truncf %10 : vector<128x128xf32> to vector<128x128xbf16>
    %c0_7 = arith.constant 0 : index
    %c0_8 = arith.constant 0 : index
    %12 = vector.load %arg4[%c0_7, %c0_8] : memref<128x256xbf16, #tpu.memory_space<vmem>>, vector<128x256xbf16>
    %cst_9 = arith.constant dense<0.000000e+00> : vector<128x256xf32>
    %13 = tpu.matmul %11, %12, %cst_9 {dimension_numbers = #tpu.dot_dimension_numbers<[1], [0], [0], [1], [0, 0, 1, 1], [], []>} : vector<128x128xbf16>, vector<128x256xbf16>, vector<128x256xf32> -> vector<128x256xf32>
    %14 = arith.truncf %13 : vector<128x256xf32> to vector<128x256xbf16>
    %c0_10 = arith.constant 0 : index
    %c0_11 = arith.constant 0 : index
    %15 = vector.load %arg5[%c0_10, %c0_11] : memref<128x256xbf16, #tpu.memory_space<vmem>>, vector<128x256xbf16>
    tpu.vector_store %arg5[%c0_10, %c0_11], %14 {strides = array<i32>} : memref<128x256xbf16, #tpu.memory_space<vmem>>, vector<128x256xbf16>,
    return
  }
  func.func @transform_0(%arg0: i32) -> (i32, i32) {
    %c0_i32 = arith.constant 0 : i32
    %c0_i32_0 = arith.constant 0 : i32
    return %arg0, %c0_i32 : i32, i32
  }
  func.func @transform_1(%arg0: i32) -> (i32, i32) {
    %c0_i32 = arith.constant 0 : i32
    %c0_i32_0 = arith.constant 0 : i32
    %c0_i32_1 = arith.constant 0 : i32
    return %c0_i32, %c0_i32_0 : i32, i32
  }
  func.func @transform_2(%arg0: i32) -> (i32, i32) {
    %c0_i32 = arith.constant 0 : i32
    %c0_i32_0 = arith.constant 0 : i32
    %c0_i32_1 = arith.constant 0 : i32
    return %c0_i32, %c0_i32_0 : i32, i32
  }
  func.func @transform_3(%arg0: i32) -> (i32, i32) {
    %c0_i32 = arith.constant 0 : i32
    %c0_i32_0 = arith.constant 0 : i32
    %c0_i32_1 = arith.constant 0 : i32
    return %c0_i32, %c0_i32_0 : i32, i32
  }
  func.func @transform_4(%arg0: i32) -> (i32, i32) {
    %c0_i32 = arith.constant 0 : i32
    %c0_i32_0 = arith.constant 0 : i32
    return %arg0, %c0_i32 : i32, i32
  }
}

</mosaic_0001>

<bundles_post_ra>
// kernel: _coda_prompt_pallas.1
= control target key start
LH: loop header
LB: loop body
LE: loop exit
PB: predicated region body
PF: predicated region fallthrough
CT: control target
= control target key end

     0   :  { %9 = vsyncpa [#allocation3], 0  ;;  %s1267_s0 = inlined_call_operand.vmem [shape: f32[128,32], index: 0, kind: input, shape index: {}]   ;;  %s1268_s1 = inlined_call_operand.hbm [shape: bf16[32,128], index: 1, kind: input, shape index: {}]   ;;  %s1269_s2 = inlined_call_operand.vmem [shape: f32[32,128], index: 2, kind: input, shape index: {}]   ;;  %s1270_s3 = inlined_call_operand.vmem [shape: bf16[128,256], index: 3, kind: input, shape index: {}]   ;;  %s1271_s4 = inlined_call_operand.hbm [shape: bf16[128,256], index: 4, kind: output, shape index: {}]  }
   0x1   :  { %10 = vsyncpa [#allocation4], 0  ;;  %s1083_s15 = smov [#allocation2]  }
   0x2   :  { %s18_s16 = sshll.u32 %s1083_s15, 4  ;;  %s19_s16 = int_to_ptr.vmem [resolvable:$true] %s18_s16 }
   0x3   :  { %s1047_s17 = scalar_lea.vmem %s19_s16, 256  ;;  %p1052_p1 = scmp.lt.s32.totalorder %s19_s16, %s19_s16 }
   0x4   :  { %p1048_p0 = scmp.ne.s32.totalorder %s19_s16, %s1047_s17  ;;  %p1053_p2 = scmp.lt.s32.totalorder %s1047_s17, %s1047_s17 }
   0x6   :  { %p1054_p3 = por %p1053_p2, %p1052_p1 }
   0x8   :  { %p1055_p4 = pnand %p1054_p3, %p1048_p0 }
   0xa   :  { %1058 = shalt.err (!%p1055_p4)
}
   0xb   :  { %s1084_s18 = smov 64   ;;  %s1085_s19 = smov 4  }
   0xc   :  { %24 = dma.hbm_to_vmem [thread:$0]  %s1268_s1, 256, %s19_s16, [#allocation3], %s1084_s18, %s1084_s18, %s1085_s19  }
   0xd   :  { %1079 = dma.done.wait [#allocation3], 256  }
   0xe   :  { %1080 = vsyncadd [#allocation3], 4294967040  ;;  %v214_v0 = vld [vmem:[%s1269_s2 + $0x18] sm:$0xff]  ;;  %v213_v1 = vld [vmem:[%s1269_s2 + $0x10] sm:$0xff]  ;;  %vm73_vm0 = vcmask 261120   ;;  %v1086_v62 = vmov 0  }
   0xf   :  { %926 = vmatprep.subr.mxu1 %v214_v0  ;;  %v981_v2 = vld [vmem:[#allocation2 + $0x8] sm:$0xff]   ;;  %v33_v4 = vld [vmem:[%s1267_s0] sm:$0xff]  ;;  %v35_v10 = vld [vmem:[%s1267_s0 + $0x10] sm:$0xff] }
  0x10   :  { %927 = vmatpush3.msra.mxu1 %v214_v0  ;;  %v212_v3 = vld [vmem:[%s1269_s2 + $0x8] sm:$0xff]  ;;  %906 = vmatprep.subr.bf16.mxu0 %v981_v2  ;;  %v195_v6 = vmul.f32 %v33_v4, %v33_v4  ;;  %v982_v7 = vld [vmem:[#allocation2] sm:$0xff]   ;;  %v197_v12 = vmul.f32 %v35_v10, %v35_v10  ;;  %v36_v13 = vld [vmem:[%s1267_s0 + $0x18] sm:$0xff] }
  0x11   :  { %v34_v5 = vld [vmem:[%s1267_s0 + $0x8] sm:$0xff]  ;;  %928 = vmatprep.subr.mxu1 %v213_v1  ;;  %v211_v9 = vld [vmem:[%s1269_s2] sm:$0xff]  ;;  %907 = vmatpush3.bf16.msra.mxu0 %v981_v2  ;;  %v50_v14 = vpack.c.bf16 %v36_v13, %v35_v10  ;;  %v198_v18 = vmul.f32 %v36_v13, %v36_v13  ;;  %v983_v19 = vld [vmem:[%s1270_s3 + $0x70] ss:$8 sps:$4 sm:$0xff]  }
  0x12   :  { %v49_v8 = vpack.c.bf16 %v34_v5, %v33_v4  ;;  %929 = vmatpush3.msra.mxu1 %v213_v1  ;;  %934 = vmatprep.mubr.msk.f32.mxu1 %vm73_vm0, %v195_v6  ;;  %v196_v11 = vmul.f32 %v34_v5, %v34_v5  ;;  %v37_v15 = vld [vmem:[%s1267_s0 + $0x20] sm:$0xff]  ;;  %v38_v16 = vld [vmem:[%s1267_s0 + $0x28] sm:$0xff]  ;;  %v985_v20 = vld [vmem:[%s1270_s3 + $0x74] ss:$8 sps:$4 sm:$0xff]  }
  0x13   :  { %930 = vmatprep.subr.mxu1 %v212_v3  ;;  %908 = vmatprep.subr.bf16.mxu0 %v982_v7  ;;  %v51_v17 = vpack.c.bf16 %v38_v16, %v37_v15  ;;  %v199_v21 = vmul.f32 %v37_v15, %v37_v15  ;;  %v39_v22 = vld [vmem:[%s1267_s0 + $0x30] sm:$0xff]  ;;  %v988_v23 = vld [vmem:[%s1270_s3 + $0x64] ss:$8 sps:$4 sm:$0xff]   ;;  %v40_v24 = vld [vmem:[%s1267_s0 + $0x38] sm:$0xff]  ;;  %v200_v27 = vmul.f32 %v38_v16, %v38_v16 }
  0x14   :  { %931 = vmatpush3.msra.mxu1 %v212_v3  ;;  %910 = vmatprep.mubr.msk.bf16.mxu0 %vm73_vm0, %v49_v8  ;;  %v986_v25 = vld [vmem:[%s1270_s3 + $0x60] ss:$8 sps:$4 sm:$0xff]   ;;  %v991_v26 = vld [vmem:[%s1270_s3 + $0x54] ss:$8 sps:$4 sm:$0xff]   ;;  %v201_v30 = vmul.f32 %v39_v22, %v39_v22  ;;  %v52_v31 = vpack.c.bf16 %v40_v24, %v39_v22  ;;  %v989_v33 = vld [vmem:[%s1270_s3 + $0x50] ss:$8 sps:$4 sm:$0xff]   ;;  %v202_v34 = vmul.f32 %v40_v24, %v40_v24 }
  0x15   :  { %932 = vmatprep.subr.mxu1 %v211_v9  ;;  %909 = vmatpush3.bf16.msra.mxu0 %v982_v7  ;;  %v41_v28 = vld [vmem:[%s1267_s0 + $0x40] sm:$0xff]  ;;  %v42_v29 = vld [vmem:[%s1267_s0 + $0x48] sm:$0xff]  ;;  %v43_v36 = vld [vmem:[%s1267_s0 + $0x50] sm:$0xff] }
  0x16   :  { %933 = vmatpush3.msra.mxu1 %v211_v9  ;;  %560 = vmatprep.subr.bf16.mxu0 %v985_v20  ;;  %v53_v32 = vpack.c.bf16 %v42_v29, %v41_v28  ;;  %v203_v35 = vmul.f32 %v41_v28, %v41_v28  ;;  %v204_v37 = vmul.f32 %v42_v29, %v42_v29  ;;  %v44_v39 = vld [vmem:[%s1267_s0 + $0x58] sm:$0xff]  ;;  %v45_v41 = vld [vmem:[%s1267_s0 + $0x60] sm:$0xff]  ;;  %v46_v42 = vld [vmem:[%s1267_s0 + $0x68] sm:$0xff] }
  0x17   :  { %935 = vmatmul.mubr.msk.f32.vlgmr.msra.gmra.mxu1 %vm73_vm0, %v196_v11  ;;  %958 = vmatprep.subr.bf16.mxu1 %v985_v20  ;;  %v205_v38 = vmul.f32 %v43_v36, %v43_v36  ;;  %v54_v40 = vpack.c.bf16 %v44_v39, %v43_v36  ;;  %v55_v43 = vpack.c.bf16 %v46_v42, %v45_v41  ;;  %v47_v46 = vld [vmem:[%s1267_s0 + $0x70] sm:$0xff]  ;;  %v48_v49 = vld [vmem:[%s1267_s0 + $0x78] sm:$0xff]  ;;  %v994_v52 = vld [vmem:[%s1270_s3 + $0x44] ss:$8 sps:$4 sm:$0xff]  }
  0x18   :  { %937 = vmatprep.mubr.msk.f32.mxu1 %vm73_vm0, %v197_v12  ;;  %911 = vmatmul.mubr.msk.bf16.vlgmr.msra.gmra.mxu0 %vm73_vm0, %v50_v14  ;;  %v206_v44 = vmul.f32 %v44_v39, %v44_v39  ;;  %v207_v45 = vmul.f32 %v45_v41, %v45_v41  ;;  %v208_v47 = vmul.f32 %v46_v42, %v46_v42  ;;  %v992_v53 = vld [vmem:[%s1270_s3 + $0x40] ss:$8 sps:$4 sm:$0xff]   ;;  %v997_v54 = vld [vmem:[%s1270_s3 + $0x34] ss:$8 sps:$4 sm:$0xff]   ;;  %v995_v55 = vld [vmem:[%s1270_s3 + $0x30] ss:$8 sps:$4 sm:$0xff]  }
  0x19   :  { %914 = vmatprep.mubr.msk.bf16.mxu0 %vm73_vm0, %v51_v17  ;;  %561 = vmatpush1.bf16.msra.mxu0 %v983_v19  ;;  %v209_v48 = vmul.f32 %v47_v46, %v47_v46  ;;  %v56_v50 = vpack.c.bf16 %v48_v49, %v47_v46  ;;  %v210_v51 = vmul.f32 %v48_v49, %v48_v49  ;;  %v1000_v56 = vld [vmem:[%s1270_s3 + $0x24] ss:$8 sps:$4 sm:$0xff]   ;;  %v998_v57 = vld [vmem:[%s1270_s3 + $0x20] ss:$8 sps:$4 sm:$0xff]   ;;  %v1003_v58 = vld [vmem:[%s1270_s3 + $0x14] ss:$8 sps:$4 sm:$0xff]  }
  0x1a   :  { %562 = vmatprep.subr.bf16.mxu0 %v988_v23  ;;  %966 = vmatpush1.bf16.msra.mxu1 %v983_v19  ;;  %v1001_v59 = vld [vmem:[%s1270_s3 + $0x10] ss:$8 sps:$4 sm:$0xff]   ;;  %v1006_v60 = vld [vmem:[%s1270_s3 + $0x4] ss:$8 sps:$4 sm:$0xff]   ;;  %v1004_v61 = vld [vmem:[%s1270_s3] ss:$8 sps:$4 sm:$0xff]  }
  0x1b   :  { %938 = vmatmul.mubr.msk.f32.gmra.mxu1 %vm73_vm0, %v198_v18  ;;  %959 = vmatprep.subr.bf16.mxu1 %v988_v23  ;;  %s1087_s3 = smov [#allocation5]  }
  0x1c   :  { %940 = vmatprep.mubr.msk.f32.mxu1 %vm73_vm0, %v199_v21  ;;  %s790_s10 = sshll.u32 %s1087_s3, 4  ;;  %s791_s10 = int_to_ptr.vmem [resolvable:$true] %s790_s10 }
  0x1d   :  { %563 = vmatpush1.bf16.msra.mxu0 %v986_v25  ;;  %s1059_s2 = scalar_lea.vmem %s791_s10, 2048  ;;  %p1064_p6 = scmp.lt.s32.totalorder %s791_s10, %s791_s10 }
  0x1e   :  { %564 = vmatprep.subr.bf16.mxu0 %v991_v26  ;;  %967 = vmatpush1.bf16.msra.mxu1 %v986_v25  ;;  %p1060_p5 = scmp.ne.s32.totalorder %s791_s10, %s1059_s2  ;;  %p1065_p7 = scmp.lt.s32.totalorder %s1059_s2, %s1059_s2 }
  0x1f   :  { %941 = vmatmul.mubr.msk.f32.gmra.mxu1 %vm73_vm0, %v200_v27  ;;  %960 = vmatprep.subr.bf16.mxu1 %v991_v26 }
  0x20   :  { %943 = vmatprep.mubr.msk.f32.mxu1 %vm73_vm0, %v201_v30  ;;  %915 = vmatmul.mubr.msk.bf16.gmra.mxu0 %vm73_vm0, %v52_v31  ;;  %p1066_p8 = por %p1065_p7, %p1064_p6 }
  0x21   :  { %918 = vmatprep.mubr.msk.bf16.mxu0 %vm73_vm0, %v53_v32  ;;  %565 = vmatpush1.bf16.msra.mxu0 %v989_v33 }
  0x22   :  { %968 = vmatpush1.bf16.msra.mxu1 %v989_v33  ;;  %566 = vmatprep.subr.bf16.mxu0 %v994_v52  ;;  %p1067_p9 = pnand %p1066_p8, %p1060_p5 }
  0x23   :  { %944 = vmatmul.mubr.msk.f32.gmra.mxu1 %vm73_vm0, %v202_v34  ;;  %961 = vmatprep.subr.bf16.mxu1 %v994_v52 }
  0x24   :  { %946 = vmatprep.mubr.msk.f32.mxu1 %vm73_vm0, %v203_v35 }
  0x25   :  { %567 = vmatpush1.bf16.msra.mxu0 %v992_v53 }
  0x26   :  { %969 = vmatpush1.bf16.msra.mxu1 %v992_v53  ;;  %568 = vmatprep.subr.bf16.mxu0 %v997_v54 }
  0x27   :  { %947 = vmatmul.mubr.msk.f32.gmra.mxu1 %vm73_vm0, %v204_v37  ;;  %962 = vmatprep.subr.bf16.mxu1 %v997_v54 }
  0x28   :  { %949 = vmatprep.mubr.msk.f32.mxu1 %vm73_vm0, %v205_v38  ;;  %919 = vmatmul.mubr.msk.bf16.gmra.mxu0 %vm73_vm0, %v54_v40 }
  0x29   :  { %922 = vmatprep.mubr.msk.bf16.mxu0 %vm73_vm0, %v55_v43  ;;  %569 = vmatpush1.bf16.msra.mxu0 %v995_v55 }
  0x2a   :  { %970 = vmatpush1.bf16.msra.mxu1 %v995_v55  ;;  %570 = vmatprep.subr.bf16.mxu0 %v1000_v56 }
  0x2b   :  { %950 = vmatmul.mubr.msk.f32.gmra.mxu1 %vm73_vm0, %v206_v44  ;;  %963 = vmatprep.subr.bf16.mxu1 %v1000_v56 }
  0x2c   :  { %952 = vmatprep.mubr.msk.f32.mxu1 %vm73_vm0, %v207_v45 }
  0x2d   :  { %571 = vmatpush1.bf16.msra.mxu0 %v998_v57 }
  0x2e   :  { %971 = vmatpush1.bf16.msra.mxu1 %v998_v57  ;;  %572 = vmatprep.subr.bf16.mxu0 %v1003_v58 }
  0x2f   :  { %953 = vmatmul.mubr.msk.f32.gmra.mxu1 %vm73_vm0, %v208_v47  ;;  %964 = vmatprep.subr.bf16.mxu1 %v1003_v58 }
  0x30   :  { %955 = vmatprep.mubr.msk.f32.mxu1 %vm73_vm0, %v209_v48  ;;  %923 = vmatmul.mubr.msk.bf16.gmra.mxu0 %vm73_vm0, %v56_v50 }
  0x31   :  { %573 = vmatpush1.bf16.msra.mxu0 %v1001_v59  ;;  %592 = vmatprep.mubr.bf16.mxu0 %v1086_v62 }
  0x32   :  { %972 = vmatpush1.bf16.msra.mxu1 %v1001_v59  ;;  %574 = vmatprep.subr.bf16.mxu0 %v1006_v60 }
  0x33   :  { %956 = vmatmul.mubr.msk.f32.gmra.mxu1 %vm73_vm0, %v210_v51  ;;  %965 = vmatprep.subr.bf16.mxu1 %v1006_v60 }
  0x34   :  { %632 = vmatprep.mubr.bf16.mxu1 %v1086_v62 }
  0x35   :  { %575 = vmatpush1.bf16.msra.mxu0 %v1004_v61 }
  0x36   :  { %973 = vmatpush1.bf16.msra.mxu1 %v1004_v61 }
  0xd7   :  { %v936_v63 = vpop.f32.mrf.mxu1 }
  0xd8   :  { %v409_v0 = vmax.f32 %v936_v63, 1e-24  ;;  %v912_v2 = vpop.f32.mrf.mxu0 }
  0xd9   :  { %v329_v1 = vpop.f32.mrf.mxu1 }
  0xda   :  { %1007 = vrsqrt.f32 %v409_v0  ;;  %v408_v3 = vmax.f32 %v329_v1, 1e-24  ;;  %v132_v5 = vpop.f32.mrf.mxu0 }
  0xdb   :  { %v939_v4 = vpop.f32.mrf.mxu1 }
  0xdc   :  { %1009 = vrsqrt.f32 %v408_v3  ;;  %v913_v7 = vpop.f32.mrf.mxu0  ;;  %v411_v8 = vmax.f32 %v939_v4, 1e-24 }
  0xdd   :  { %v339_v6 = vpop.f32.mrf.mxu1 }
  0xde   :  { %v410_v9 = vmax.f32 %v339_v6, 1e-24  ;;  %v135_v11 = vpop.f32.mrf.mxu0 }
  0xdf   :  { %v942_v10 = vpop.f32.mrf.mxu1 }
  0xe0   :  { %1011 = vrsqrt.f32 %v410_v9  ;;  %v1252_v13 = vpop.f32.mrf.mxu0  ;;  %v413_v17 = vmax.f32 %v942_v10, 1e-24 }
  0xe1   :  { %v349_v12 = vpop.f32.mrf.mxu1  ;;  %1013 = vrsqrt.f32 %v411_v8 }
  0xe2   :  { %v148_v15 = vpop.f32.mrf.mxu0  ;;  %v412_v16 = vmax.f32 %v349_v12, 1e-24 }
  0xe3   :  { %v945_v14 = vpop.f32.mrf.mxu1 }
  0xe4   :  { %v1254_v19 = vpop.f32.mrf.mxu0  ;;  %1015 = vrsqrt.f32 %v412_v16  ;;  %v415_v34 = vmax.f32 %v945_v14, 1e-24 }
  0xe5   :  { %v359_v18 = vpop.f32.mrf.mxu1  ;;  %1017 = vrsqrt.f32 %v413_v17 }
  0xe6   :  { %v151_v22 = vpop.f32.mrf.mxu0  ;;  %v414_v29 = vmax.f32 %v359_v18, 1e-24 }
  0xe7   :  { %v1008_v20 = vpop.eup %1007  ;;  %v948_v21 = vpop.f32.mrf.mxu1 }
  0xe8   :  { %v417_v23 = vmax.f32 %v948_v21, 1e-24  ;;  %v441_v27 = vmul.f32 %v1008_v20, %v135_v11  ;;  %v920_v31 = vpop.f32.mrf.mxu0 }
  0xe9   :  { %v1010_v24 = vpop.eup %1009  ;;  %v369_v25 = vpop.f32.mrf.mxu1 }
  0xea   :  { %v440_v26 = vmul.f32 %v1010_v24, %v132_v5  ;;  %1019 = vrsqrt.f32 %v417_v23  ;;  %v416_v28 = vmax.f32 %v369_v25, 1e-24  ;;  %v164_v39 = vpop.f32.mrf.mxu0 }
  0xeb   :  { %v951_v30 = vpop.f32.mrf.mxu1 }
  0xec   :  { %v456_v32 = vpack.c.bf16 %v441_v27, %v440_v26  ;;  %1021 = vrsqrt.f32 %v416_v28  ;;  %v419_v36 = vmax.f32 %v951_v30, 1e-24  ;;  %v921_v45 = vpop.f32.mrf.mxu0 }
  0xed   :  { %v1012_v33 = vpop.eup %1011  ;;  %v379_v35 = vpop.f32.mrf.mxu1  ;;  %1023 = vrsqrt.f32 %v414_v29 }
  0xee   :  { %v418_v37 = vmax.f32 %v379_v35, 1e-24  ;;  %593 = vmatmul.mubr.bf16.vlgmr.msra.gmra.mxu0 %v456_v32  ;;  %v1014_v38 = vpop.eup %1013  ;;  %v442_v41 = vmul.f32 %v1012_v33, %v912_v2  ;;  %v167_v52 = vpop.f32.mrf.mxu0 }
  0xef   :  { %v954_v40 = vpop.f32.mrf.mxu1  ;;  %602 = vmatprep.mubr.bf16.mxu0 %v1086_v62  ;;  %v443_v43 = vmul.f32 %v1014_v38, %v913_v7 }
  0xf0   :  { %1025 = vrsqrt.f32 %v418_v37  ;;  %v421_v44 = vmax.f32 %v954_v40, 1e-24  ;;  %v924_v56 = vpop.f32.mrf.mxu0 }
  0xf1   :  { %1027 = vrsqrt.f32 %v415_v34  ;;  %v389_v42 = vpop.f32.mrf.mxu1  ;;  %v457_v46 = vpack.c.bf16 %v443_v43, %v442_v41  ;;  %v1016_v48 = vpop.eup %1015 }
  0xf2   :  { %1029 = vrsqrt.f32 %v419_v36  ;;  %v420_v47 = vmax.f32 %v389_v42, 1e-24  ;;  %v1018_v50 = vpop.eup %1017  ;;  %v444_v53 = vmul.f32 %v1016_v48, %v148_v15  ;;  %v180_v2 = vpop.f32.mrf.mxu0 }
  0xf3   :  { %v957_v49 = vpop.f32.mrf.mxu1  ;;  %1031 = vrsqrt.f32 %v421_v44  ;;  %v445_v57 = vmul.f32 %v1018_v50, %v151_v22 }
  0xf4   :  { %1033 = vrsqrt.f32 %v420_v47  ;;  %v423_v4 = vmax.f32 %v957_v49, 1e-24  ;;  %v925_v8 = vpop.f32.mrf.mxu0 }
  0xf5   :  { %v399_v55 = vpop.f32.mrf.mxu1  ;;  %v458_v61 = vpack.c.bf16 %v445_v57, %v444_v53 }
  0xf6   :  { %603 = vmatmul.mubr.bf16.gmra.mxu0 %v457_v46  ;;  %v422_v0 = vmax.f32 %v399_v55, 1e-24  ;;  %v183_v16 = vpop.f32.mrf.mxu0 }
  0xf7   :  { %v1020_v51 = vpop.eup %1019  ;;  %612 = vmatprep.mubr.bf16.mxu0 %v1086_v62 }
  0xf8   :  { %v449_v59 = vmul.f32 %v1020_v51, %v167_v52  ;;  %1035 = vrsqrt.f32 %v422_v0 }
  0xf9   :  { %v1022_v54 = vpop.eup %1021  ;;  %1037 = vrsqrt.f32 %v423_v4 }
  0xfa   :  { %v448_v58 = vmul.f32 %v1022_v54, %v164_v39  ;;  %v1024_v60 = vpop.eup %1023 }
  0xfb   :  { %v446_v6 = vmul.f32 %v1024_v60, %v1252_v13 }
  0xfc   :  { %v460_v63 = vpack.c.bf16 %v449_v59, %v448_v58 }
  0xfd   :  { %v1026_v1 = vpop.eup %1025 }
  0xfe   :  { %v1028_v3 = vpop.eup %1027  ;;  %613 = vmatmul.mubr.bf16.gmra.mxu0 %v458_v61  ;;  %633 = vmatmul.mubr.bf16.vlgmr.msra.gmra.mxu1 %v460_v63  ;;  %v450_v7 = vmul.f32 %v1026_v1, %v920_v31 }
  0xff   :  { %v1030_v5 = vpop.eup %1029  ;;  %622 = vmatprep.mubr.bf16.mxu0 %v1086_v62  ;;  %642 = vmatprep.mubr.bf16.mxu1 %v1086_v62  ;;  %v447_v9 = vmul.f32 %v1028_v3, %v1254_v19 }
 0x100   :  { %v451_v10 = vmul.f32 %v1030_v5, %v921_v45  ;;  %v1032_v11 = vpop.eup %1031 }
 0x101   :  { %v459_v12 = vpack.c.bf16 %v447_v9, %v446_v6  ;;  %v1034_v15 = vpop.eup %1033  ;;  %v453_v18 = vmul.f32 %v1032_v11, %v183_v16 }
 0x102   :  { %v461_v14 = vpack.c.bf16 %v451_v10, %v450_v7  ;;  %v452_v17 = vmul.f32 %v1034_v15, %v180_v2 }
 0x104   :  { %v462_v20 = vpack.c.bf16 %v453_v18, %v452_v17 }
 0x105   :  { %v1036_v13 = vpop.eup %1035 }
 0x106   :  { %623 = vmatmul.mubr.bf16.gmra.mxu0 %v459_v12  ;;  %643 = vmatmul.mubr.bf16.gmra.mxu1 %v461_v14  ;;  %v1038_v21 = vpop.eup %1037  ;;  %v454_v19 = vmul.f32 %v1036_v13, %v924_v56 }
 0x107   :  { %652 = vmatprep.mubr.bf16.mxu1 %v1086_v62  ;;  %v455_v22 = vmul.f32 %v1038_v21, %v925_v8 }
 0x109   :  { %v463_v23 = vpack.c.bf16 %v455_v22, %v454_v19 }
 0x10e   :  { %653 = vmatmul.mubr.bf16.gmra.mxu1 %v462_v20 }
 0x10f   :  { %662 = vmatprep.mubr.bf16.mxu1 %v1086_v62 }
 0x116   :  { %663 = vmatmul.mubr.bf16.gmra.mxu1 %v463_v23 }
 0x1ae   :  { %v594_v24 = vpop.f32.mrf.mxu0 }
 0x1b0   :  { %v596_v25 = vpop.f32.mrf.mxu0 }
 0x1b1   :  { %v860_v26 = vpack.c.bf16 %v596_v25, %v594_v24 }
 0x1b2   :  { %v598_v27 = vpop.f32.mrf.mxu0 }
 0x1b3   :  { %769 = vst [vmem:[#allocation5] sm:$0xff] %v860_v26 }
 0x1b4   :  { %v600_v28 = vpop.f32.mrf.mxu0 }
 0x1b5   :  { %v861_v29 = vpack.c.bf16 %v600_v28, %v598_v27 }
 0x1b6   :  { %v604_v30 = vpop.f32.mrf.mxu0 }
 0x1b7   :  { %770 = vst [vmem:[#allocation5 + $0x8] sm:$0xff] %v861_v29 }
 0x1b8   :  { %v606_v31 = vpop.f32.mrf.mxu0 }
 0x1b9   :  { %v862_v32 = vpack.c.bf16 %v606_v31, %v604_v30 }
 0x1ba   :  { %v608_v33 = vpop.f32.mrf.mxu0 }
 0x1bb   :  { %771 = vst [vmem:[#allocation5 + $0x10] sm:$0xff] %v862_v32 }
 0x1bc   :  { %v610_v34 = vpop.f32.mrf.mxu0 }
 0x1bd   :  { %v863_v35 = vpack.c.bf16 %v610_v34, %v608_v33 }
 0x1be   :  { %v614_v62 = vpop.f32.mrf.mxu0  ;;  %v634_v36 = vpop.f32.mrf.mxu1 }
 0x1bf   :  { %772 = vst [vmem:[#allocation5 + $0x18] sm:$0xff] %v863_v35 }
 0x1c0   :  { %v616_v37 = vpop.f32.mrf.mxu0  ;;  %v636_v38 = vpop.f32.mrf.mxu1 }
 0x1c1   :  { %v864_v39 = vpack.c.bf16 %v616_v37, %v614_v62  ;;  %v868_v40 = vpack.c.bf16 %v636_v38, %v634_v36 }
 0x1c2   :  { %v618_v41 = vpop.f32.mrf.mxu0  ;;  %v638_v42 = vpop.f32.mrf.mxu1 }
 0x1c3   :  { %773 = vst [vmem:[#allocation5 + $0x20] sm:$0xff] %v864_v39  ;;  %777 = vst [vmem:[#allocation5 + $0x40] sm:$0xff] %v868_v40 }
 0x1c4   :  { %v620_v43 = vpop.f32.mrf.mxu0  ;;  %v640_v44 = vpop.f32.mrf.mxu1 }
 0x1c5   :  { %v865_v45 = vpack.c.bf16 %v620_v43, %v618_v41  ;;  %v869_v46 = vpack.c.bf16 %v640_v44, %v638_v42 }
 0x1c6   :  { %v624_v47 = vpop.f32.mrf.mxu0  ;;  %v644_v48 = vpop.f32.mrf.mxu1 }
 0x1c7   :  { %774 = vst [vmem:[#allocation5 + $0x28] sm:$0xff] %v865_v45  ;;  %778 = vst [vmem:[#allocation5 + $0x48] sm:$0xff] %v869_v46 }
 0x1c8   :  { %v626_v49 = vpop.f32.mrf.mxu0  ;;  %v646_v50 = vpop.f32.mrf.mxu1 }
 0x1c9   :  { %v866_v51 = vpack.c.bf16 %v626_v49, %v624_v47  ;;  %v870_v52 = vpack.c.bf16 %v646_v50, %v644_v48 }
 0x1ca   :  { %v628_v53 = vpop.f32.mrf.mxu0  ;;  %v648_v54 = vpop.f32.mrf.mxu1 }
 0x1cb   :  { %775 = vst [vmem:[#allocation5 + $0x30] sm:$0xff] %v866_v51  ;;  %779 = vst [vmem:[#allocation5 + $0x50] sm:$0xff] %v870_v52 }
 0x1cc   :  { %v630_v55 = vpop.f32.mrf.mxu0  ;;  %v650_v56 = vpop.f32.mrf.mxu1 }
 0x1cd   :  { %v867_v57 = vpack.c.bf16 %v630_v55, %v628_v53  ;;  %v871_v58 = vpack.c.bf16 %v650_v56, %v648_v54 }
 0x1ce   :  { %v654_v59 = vpop.f32.mrf.mxu1 }
 0x1cf   :  { %776 = vst [vmem:[#allocation5 + $0x38] sm:$0xff] %v867_v57  ;;  %780 = vst [vmem:[#allocation5 + $0x58] sm:$0xff] %v871_v58 }
 0x1d0   :  { %v656_v60 = vpop.f32.mrf.mxu1 }
 0x1d1   :  { %v872_v61 = vpack.c.bf16 %v656_v60, %v654_v59 }
 0x1d2   :  { %v658_v63 = vpop.f32.mrf.mxu1 }
 0x1d3   :  { %781 = vst [vmem:[#allocation5 + $0x60] sm:$0xff] %v872_v61 }
 0x1d4   :  { %v660_v0 = vpop.f32.mrf.mxu1 }
 0x1d5   :  { %v873_v1 = vpack.c.bf16 %v660_v0, %v658_v63 }
 0x1d6   :  { %v664_v2 = vpop.f32.mrf.mxu1 }
 0x1d7   :  { %782 = vst [vmem:[#allocation5 + $0x68] sm:$0xff] %v873_v1 }
 0x1d8   :  { %v666_v3 = vpop.f32.mrf.mxu1 }
 0x1d9   :  { %v874_v4 = vpack.c.bf16 %v666_v3, %v664_v2 }
 0x1da   :  { %v668_v5 = vpop.f32.mrf.mxu1 }
 0x1db   :  { %783 = vst [vmem:[#allocation5 + $0x70] sm:$0xff] %v874_v4 }
 0x1dc   :  { %v670_v6 = vpop.f32.mrf.mxu1 }
 0x1dd   :  { %v875_v7 = vpack.c.bf16 %v670_v6, %v668_v5 }
 0x1df   :  { %784 = vst [vmem:[#allocation5 + $0x78] sm:$0xff] %v875_v7 }
 0x1e0   :  { %1070 = shalt.err (!%p1067_p9)
}
 0x1e1   :  { %s1088_s11 = smov 128   ;;  %s1089_s12 = smov 8  }
 0x1e2   :  { %796 = dma.vmem_to_hbm [thread:$0]  %s791_s10, 2048, %s1271_s4, [#allocation4], %s1088_s11, %s1088_s11, %s1089_s12  }
 0x1e3   :  { %1081 = dma.done.wait [#allocation4], 2048  }
 0x1e4   :  { %1082 = vsyncadd [#allocation4], 4294965248 }
 0x1e5   :  { %800 = vsyncpa [#allocation3], 1 }
 0x1e6   :  { %801 = vsyncpa [#allocation4], 1 }

</bundles_post_ra>
